<compile_context>
chip_gen: v7x
topology: tpu7x:2x2x1
jax: 0.10.0
libtpu: 0.0.40
codegen_flags: <defaults>
</compile_context>

<pallas_src>
import functools

import jax
import jax.numpy as jnp
from jax.experimental import pallas as pl
from jax.experimental.pallas import tpu as pltpu


def _rnn_kernel(emb_ref, cnn_ref, h0_ref, we_ref, wc_ref, wh_ref, b_ref,
                wout_ref, bout_ref, logits_ref, hfinal_ref, hseq, *, T, B, E, H):
    # ---- hoisted, non-recurrent work (off the serial critical path) ----
    # Time-invariant part: cnn @ W_c + bias  -> [B, H]
    base = (jnp.dot(cnn_ref[...], wc_ref[...], preferred_element_type=jnp.float32)
            + b_ref[...])
    # Input projection for ALL timesteps as one batched matmul: [T*B, E] x [E, H]
    emb2d = emb_ref[...].reshape(T * B, E)
    pre_all = (jnp.dot(emb2d, we_ref[...], preferred_element_type=jnp.float32)
               .reshape(T, B, H)
               + base[None, :, :])                              # [T, B, H]

    # ---- serial recurrence: one small MXU push + tanh per step ----
    h = h0_ref[...]                                             # [B, H]
    for t in range(T):   # T is small & static -> full unroll, LLO scheduler sees everything
        h = jnp.tanh(pre_all[t]
                     + jnp.dot(h, wh_ref[...], preferred_element_type=jnp.float32))
        hseq[t] = h
    hfinal_ref[...] = h.astype(hfinal_ref.dtype)                # written exactly once

    # ---- deferred output projection: one [T*B, H] x [H, Vp] matmul, lane-dense Vp ----
    # TODO(synk): for a realistic vocabulary, tile Vp as a "parallel" grid axis (shards the
    # output matmul across v7x's two TensorCores and keeps tiles within 64 MiB VMEM).
    Vp = wout_ref.shape[1]
    logits2d = (jnp.dot(hseq[...].reshape(T * B, H), wout_ref[...],
                        preferred_element_type=jnp.float32)
                + bout_ref[...])                                # [T*B, Vp]
    logits_ref[...] = logits2d.reshape(T, B, Vp).astype(logits_ref.dtype)


def rnn_one_layer_forward(tokens, processed_cnn_features, initial_hidden_state,
                          cell_w, cell_b, output_w, output_b, embedding_table):
    """Mirrors RNNOneLayerSimplified.forward with is_train=True.

    tokens:                  [B, T] int32
    processed_cnn_features:  [B, C] float32
    initial_hidden_state:    [1, B, H] float32
    cell_w:                  [E + C + H, H] float32   (RNNsimpleCell.weight)
    cell_b:                  [1, H] float32           (RNNsimpleCell.bias)
    output_w:                [H, V] float32           (nn.Linear.weight.T)
    output_b:                [V]    float32
    embedding_table:         [vocab, E] float32
    returns: (logits [B, T, V], final hidden [1, B, H])
    """
    B, T = tokens.shape
    E = embedding_table.shape[1]
    C = processed_cnn_features.shape[1]
    H = initial_hidden_state.shape[2]
    V = output_w.shape[1]
    Vp = ((V + 127) // 128) * 128                             # lane-dense vocab dim

    # Glue: embedding gather directly in time-major order (no transpose of the embedded
    # sequence in HBM; only the tiny [B, T] token matrix is transposed).
    emb_seq = jnp.take(embedding_table, tokens.T, axis=0)     # [T, B, E]
    h0 = initial_hidden_state[0]                              # [B, H]

    # Pre-split cell weight; concat order in the module is (embedding, cnn_feat, hidden).
    w_e = cell_w[:E]                                          # [E, H]
    w_c = cell_w[E:E + C]                                     # [C, H]
    w_h = cell_w[E + C:]                                      # [H, H]

    # Zero-pad vocab dim of the output layer so the kernel's logits store is lane-dense.
    wout_p = jnp.pad(output_w, ((0, 0), (0, Vp - V)))         # [H, Vp]
    bout_p = jnp.pad(output_b, (0, Vp - V)).reshape(1, Vp)    # [1, Vp]

    kernel = functools.partial(_rnn_kernel, T=T, B=B, E=E, H=H)

    logits_tbv, h_final = pl.pallas_call(
        kernel,
        out_shape=(
            jax.ShapeDtypeStruct((T, B, Vp), jnp.float32),
            jax.ShapeDtypeStruct((B, H), jnp.float32),
        ),
        grid_spec=pltpu.PrefetchScalarGridSpec(
            num_scalar_prefetch=0,
            grid=(1,),                                        # whole recurrence in one step
            in_specs=[
                pl.BlockSpec((T, B, E), lambda i: (0, 0, 0)),  # embeddings, whole sequence
                pl.BlockSpec((B, C), lambda i: (0, 0)),        # cnn features
                pl.BlockSpec((B, H), lambda i: (0, 0)),        # initial hidden
                pl.BlockSpec((E, H), lambda i: (0, 0)),        # W_e
                pl.BlockSpec((C, H), lambda i: (0, 0)),        # W_c
                pl.BlockSpec((H, H), lambda i: (0, 0)),        # W_h
                pl.BlockSpec((1, H), lambda i: (0, 0)),        # cell bias
                pl.BlockSpec((H, Vp), lambda i: (0, 0)),       # output weight (padded)
                pl.BlockSpec((1, Vp), lambda i: (0, 0)),       # output bias (padded)
            ],
            out_specs=[
                pl.BlockSpec((T, B, Vp), lambda i: (0, 0, 0)), # logits, lane-dense last dim
                pl.BlockSpec((B, H), lambda i: (0, 0)),        # final hidden
            ],
            scratch_shapes=[pltpu.VMEM((T, B, H), jnp.float32)],
        ),
        compiler_params=pltpu.CompilerParams(
            dimension_semantics=("arbitrary",)),               # single (sequential) step
    )(emb_seq, processed_cnn_features, h0, w_e, w_c, w_h, cell_b, wout_p, bout_p)

    logits = jnp.transpose(logits_tbv[:, :, :V], (1, 0, 2))    # [B, T, V]
    return logits, h_final[None, :, :]                         # [1, B, H]


def _reference_forward(tokens, cnn_feat, h0, cell_w, cell_b, output_w, output_b,
                       emb_table):
    """Plain-JAX reference matching the PyTorch forward (is_train=True)."""
    B, T = tokens.shape
    emb_all = jnp.take(emb_table, tokens, axis=0)              # [B, T, E]
    h = h0[0]
    logits_list = []
    for i in range(T):
        x = jnp.concatenate([emb_all[:, i, :], cnn_feat], axis=1)
        x2 = jnp.concatenate([x, h], axis=1)
        h = jnp.tanh(x2 @ cell_w + cell_b)
        logits_list.append(h @ output_w + output_b[None, :])
    return jnp.stack(logits_list, axis=1), h[None, :, :]


if __name__ == "__main__":
    # Small shapes consistent with the module.
    B, T = 4, 8          # batch, truncated_backpropagation_length
    E, C = 32, 32        # embedding size, processed-cnn-feature size
    H, V = 32, 64        # hidden_state_size, vocabulary_size
    INPUT_SIZE = E + C   # RNN cell "input_size"

    key = jax.random.PRNGKey(0)
    k_tok, k_cnn, k_h0, k_w, k_emb, k_ow, k_ob = jax.random.split(key, 7)

    tokens = jax.random.randint(k_tok, (B, T), 0, V, dtype=jnp.int32)
    cnn_feat = jax.random.normal(k_cnn, (B, C), dtype=jnp.float32)
    h0 = jax.random.normal(k_h0, (1, B, H), dtype=jnp.float32)

    # RNNsimpleCell params: variance-scaled weight, zero bias.
    cell_w = (jax.random.normal(k_w, (INPUT_SIZE + H, H), dtype=jnp.float32)
              / jnp.sqrt(jnp.float32(INPUT_SIZE + H)))
    cell_b = jnp.zeros((1, H), dtype=jnp.float32)

    # output_layer (nn.Linear(H, V)) and embedding_layer (nn.Embedding(V, E)) params.
    output_w = jax.random.normal(k_ow, (H, V), dtype=jnp.float32) / jnp.sqrt(jnp.float32(H))
    output_b = jax.random.normal(k_ob, (V,), dtype=jnp.float32) * 0.01
    emb_table = jax.random.normal(k_emb, (V, E), dtype=jnp.float32)

    logits, h_final = rnn_one_layer_forward(tokens, cnn_feat, h0, cell_w, cell_b,
                                            output_w, output_b, emb_table)
    logits = jax.block_until_ready(logits)
    h_final = jax.block_until_ready(h_final)

    ref_logits, ref_h = _reference_forward(tokens, cnn_feat, h0, cell_w, cell_b,
                                           output_w, output_b, emb_table)

    assert logits.shape == (B, T, V)
    assert h_final.shape == (1, B, H)
    assert jnp.allclose(logits, ref_logits, atol=1e-4, rtol=1e-4)
    assert jnp.allclose(h_final, ref_h, atol=1e-4, rtol=1e-4)

    print("KERNEL_OK")
</pallas_src>

<mosaic_0001>
module attributes {stable_mosaic.version = 11 : i64} {
  func.func @_rnn_kernel(%arg0: i32, %arg1: memref<8x4x32xf32, #tpu.memory_space<vmem>>, %arg2: memref<4x32xf32, #tpu.memory_space<vmem>>, %arg3: memref<4x32xf32, #tpu.memory_space<vmem>>, %arg4: memref<32x32xf32, #tpu.memory_space<vmem>>, %arg5: memref<32x32xf32, #tpu.memory_space<vmem>>, %arg6: memref<32x32xf32, #tpu.memory_space<vmem>>, %arg7: memref<1x32xf32, #tpu.memory_space<vmem>>, %arg8: memref<32x128xf32, #tpu.memory_space<vmem>>, %arg9: memref<1x128xf32, #tpu.memory_space<vmem>>, %arg10: memref<8x4x128xf32, #tpu.memory_space<vmem>>, %arg11: memref<4x32xf32, #tpu.memory_space<vmem>>, %arg12: memref<8x4x32xf32, #tpu.memory_space<vmem>>) attributes {dimension_semantics = [#tpu.dimension_semantics<arbitrary>], iteration_bounds = array<i64: 1>, scalar_prefetch = 0 : i64, scratch_operands = 1 : i64, tpu.core_type = #tpu.core_type<tc>, window_params = [{pipeline_mode = #tpu.pipeline_mode<synchronous>, transform_indices = @transform_0, window_bounds = array<i64: 8, 4, 32>}, {pipeline_mode = #tpu.pipeline_mode<synchronous>, transform_indices = @transform_1, window_bounds = array<i64: 4, 32>}, {pipeline_mode = #tpu.pipeline_mode<synchronous>, transform_indices = @transform_2, window_bounds = array<i64: 4, 32>}, {pipeline_mode = #tpu.pipeline_mode<synchronous>, transform_indices = @transform_3, window_bounds = array<i64: 32, 32>}, {pipeline_mode = #tpu.pipeline_mode<synchronous>, transform_indices = @transform_4, window_bounds = array<i64: 32, 32>}, {pipeline_mode = #tpu.pipeline_mode<synchronous>, transform_indices = @transform_5, window_bounds = array<i64: 32, 32>}, {pipeline_mode = #tpu.pipeline_mode<synchronous>, transform_indices = @transform_6, window_bounds = array<i64: 1, 32>}, {pipeline_mode = #tpu.pipeline_mode<synchronous>, transform_indices = @transform_7, window_bounds = array<i64: 32, 128>}, {pipeline_mode = #tpu.pipeline_mode<synchronous>, transform_indices = @transform_8, window_bounds = array<i64: 1, 128>}, {pipeline_mode = #tpu.pipeline_mode<synchronous>, transform_indices = @transform_9, window_bounds = array<i64: 8, 4, 128>}, {pipeline_mode = #tpu.pipeline_mode<synchronous>, transform_indices = @transform_10, window_bounds = array<i64: 4, 32>}]} {
    %c0 = arith.constant 0 : index
    %c0_0 = arith.constant 0 : index
    %0 = vector.load %arg2[%c0, %c0_0] : memref<4x32xf32, #tpu.memory_space<vmem>>, vector<4x32xf32>
    %c0_1 = arith.constant 0 : index
    %c0_2 = arith.constant 0 : index
    %1 = vector.load %arg5[%c0_1, %c0_2] : memref<32x32xf32, #tpu.memory_space<vmem>>, vector<32x32xf32>
    %cst = arith.constant dense<0.000000e+00> : vector<4x32xf32>
    %2 = tpu.matmul %0, %1, %cst {dimension_numbers = #tpu.dot_dimension_numbers<[1], [0], [0], [1], [0, 0, 1, 1], [], []>} : vector<4x32xf32>, vector<32x32xf32>, vector<4x32xf32> -> vector<4x32xf32>
    %c0_3 = arith.constant 0 : index
    %c0_4 = arith.constant 0 : index
    %3 = vector.load %arg7[%c0_3, %c0_4] : memref<1x32xf32, #tpu.memory_space<vmem>>, vector<1x32xf32>
    %4 = vector.broadcast %3 : vector<1x32xf32> to vector<4x32xf32>
    %5 = arith.addf %2, %4 : vector<4x32xf32>
    %c0_5 = arith.constant 0 : index
    %c0_6 = arith.constant 0 : index
    %c0_7 = arith.constant 0 : index
    %6 = vector.load %arg1[%c0_5, %c0_6, %c0_7] : memref<8x4x32xf32, #tpu.memory_space<vmem>>, vector<8x4x32xf32>
    %7 = vector.shape_cast %6 : vector<8x4x32xf32> to vector<32x32xf32>
    %c0_8 = arith.constant 0 : index
    %c0_9 = arith.constant 0 : index
    %8 = vector.load %arg4[%c0_8, %c0_9] : memref<32x32xf32, #tpu.memory_space<vmem>>, vector<32x32xf32>
    %cst_10 = arith.constant dense<0.000000e+00> : vector<32x32xf32>
    %9 = tpu.matmul %7, %8, %cst_10 {dimension_numbers = #tpu.dot_dimension_numbers<[1], [0], [0], [1], [0, 0, 1, 1], [], []>} : vector<32x32xf32>, vector<32x32xf32>, vector<32x32xf32> -> vector<32x32xf32>
    %10 = vector.shape_cast %9 : vector<32x32xf32> to vector<8x4x32xf32>
    %11 = vector.shape_cast %5 : vector<4x32xf32> to vector<1x4x32xf32>
    %12 = vector.broadcast %11 : vector<1x4x32xf32> to vector<8x4x32xf32>
    %13 = arith.addf %10, %12 : vector<8x4x32xf32>
    %c0_11 = arith.constant 0 : index
    %c0_12 = arith.constant 0 : index
    %14 = vector.load %arg3[%c0_11, %c0_12] : memref<4x32xf32, #tpu.memory_space<vmem>>, vector<4x32xf32>
    %15 = vector.extract_strided_slice %13 {offsets = [0, 0, 0], sizes = [1, 4, 32], strides = [1, 1, 1]} : vector<8x4x32xf32> to vector<1x4x32xf32>
    %16 = vector.shape_cast %15 : vector<1x4x32xf32> to vector<4x32xf32>
    %c0_13 = arith.constant 0 : index
    %c0_14 = arith.constant 0 : index
    %17 = vector.load %arg6[%c0_13, %c0_14] : memref<32x32xf32, #tpu.memory_space<vmem>>, vector<32x32xf32>
    %cst_15 = arith.constant dense<0.000000e+00> : vector<4x32xf32>
    %18 = tpu.matmul %14, %17, %cst_15 {dimension_numbers = #tpu.dot_dimension_numbers<[1], [0], [0], [1], [0, 0, 1, 1], [], []>} : vector<4x32xf32>, vector<32x32xf32>, vector<4x32xf32> -> vector<4x32xf32>
    %19 = arith.addf %16, %18 : vector<4x32xf32>
    %20 = math.tanh %19 : vector<4x32xf32>
    %c0_16 = arith.constant 0 : index
    %c0_17 = arith.constant 0 : index
    %c0_18 = arith.constant 0 : index
    %21 = vector.load %arg12[%c0_16, %c0_17, %c0_18] : memref<8x4x32xf32, #tpu.memory_space<vmem>>, vector<1x4x32xf32>
    %22 = vector.shape_cast %21 : vector<1x4x32xf32> to vector<4x32xf32>
    %23 = vector.shape_cast %20 : vector<4x32xf32> to vector<1x4x32xf32>
    tpu.vector_store %arg12[%c0_16, %c0_17, %c0_18], %23 {strides = array<i32>} : memref<8x4x32xf32, #tpu.memory_space<vmem>>, vector<1x4x32xf32>,
    %24 = vector.extract_strided_slice %13 {offsets = [1, 0, 0], sizes = [1, 4, 32], strides = [1, 1, 1]} : vector<8x4x32xf32> to vector<1x4x32xf32>
    %25 = vector.shape_cast %24 : vector<1x4x32xf32> to vector<4x32xf32>
    %c0_19 = arith.constant 0 : index
    %c0_20 = arith.constant 0 : index
    %26 = vector.load %arg6[%c0_19, %c0_20] : memref<32x32xf32, #tpu.memory_space<vmem>>, vector<32x32xf32>
    %cst_21 = arith.constant dense<0.000000e+00> : vector<4x32xf32>
    %27 = tpu.matmul %20, %26, %cst_21 {dimension_numbers = #tpu.dot_dimension_numbers<[1], [0], [0], [1], [0, 0, 1, 1], [], []>} : vector<4x32xf32>, vector<32x32xf32>, vector<4x32xf32> -> vector<4x32xf32>
    %28 = arith.addf %25, %27 : vector<4x32xf32>
    %29 = math.tanh %28 : vector<4x32xf32>
    %c1 = arith.constant 1 : index
    %c0_22 = arith.constant 0 : index
    %c0_23 = arith.constant 0 : index
    %30 = vector.load %arg12[%c1, %c0_22, %c0_23] : memref<8x4x32xf32, #tpu.memory_space<vmem>>, vector<1x4x32xf32>
    %31 = vector.shape_cast %30 : vector<1x4x32xf32> to vector<4x32xf32>
    %32 = vector.shape_cast %29 : vector<4x32xf32> to vector<1x4x32xf32>
    tpu.vector_store %arg12[%c1, %c0_22, %c0_23], %32 {strides = array<i32>} : memref<8x4x32xf32, #tpu.memory_space<vmem>>, vector<1x4x32xf32>,
    %33 = vector.extract_strided_slice %13 {offsets = [2, 0, 0], sizes = [1, 4, 32], strides = [1, 1, 1]} : vector<8x4x32xf32> to vector<1x4x32xf32>
    %34 = vector.shape_cast %33 : vector<1x4x32xf32> to vector<4x32xf32>
    %c0_24 = arith.constant 0 : index
    %c0_25 = arith.constant 0 : index
    %35 = vector.load %arg6[%c0_24, %c0_25] : memref<32x32xf32, #tpu.memory_space<vmem>>, vector<32x32xf32>
    %cst_26 = arith.constant dense<0.000000e+00> : vector<4x32xf32>
    %36 = tpu.matmul %29, %35, %cst_26 {dimension_numbers = #tpu.dot_dimension_numbers<[1], [0], [0], [1], [0, 0, 1, 1], [], []>} : vector<4x32xf32>, vector<32x32xf32>, vector<4x32xf32> -> vector<4x32xf32>
    %37 = arith.addf %34, %36 : vector<4x32xf32>
    %38 = math.tanh %37 : vector<4x32xf32>
    %c2 = arith.constant 2 : index
    %c0_27 = arith.constant 0 : index
    %c0_28 = arith.constant 0 : index
    %39 = vector.load %arg12[%c2, %c0_27, %c0_28] : memref<8x4x32xf32, #tpu.memory_space<vmem>>, vector<1x4x32xf32>
    %40 = vector.shape_cast %39 : vector<1x4x32xf32> to vector<4x32xf32>
    %41 = vector.shape_cast %38 : vector<4x32xf32> to vector<1x4x32xf32>
    tpu.vector_store %arg12[%c2, %c0_27, %c0_28], %41 {strides = array<i32>} : memref<8x4x32xf32, #tpu.memory_space<vmem>>, vector<1x4x32xf32>,
    %42 = vector.extract_strided_slice %13 {offsets = [3, 0, 0], sizes = [1, 4, 32], strides = [1, 1, 1]} : vector<8x4x32xf32> to vector<1x4x32xf32>
    %43 = vector.shape_cast %42 : vector<1x4x32xf32> to vector<4x32xf32>
    %c0_29 = arith.constant 0 : index
    %c0_30 = arith.constant 0 : index
    %44 = vector.load %arg6[%c0_29, %c0_30] : memref<32x32xf32, #tpu.memory_space<vmem>>, vector<32x32xf32>
    %cst_31 = arith.constant dense<0.000000e+00> : vector<4x32xf32>
    %45 = tpu.matmul %38, %44, %cst_31 {dimension_numbers = #tpu.dot_dimension_numbers<[1], [0], [0], [1], [0, 0, 1, 1], [], []>} : vector<4x32xf32>, vector<32x32xf32>, vector<4x32xf32> -> vector<4x32xf32>
    %46 = arith.addf %43, %45 : vector<4x32xf32>
    %47 = math.tanh %46 : vector<4x32xf32>
    %c3 = arith.constant 3 : index
    %c0_32 = arith.constant 0 : index
    %c0_33 = arith.constant 0 : index
    %48 = vector.load %arg12[%c3, %c0_32, %c0_33] : memref<8x4x32xf32, #tpu.memory_space<vmem>>, vector<1x4x32xf32>
    %49 = vector.shape_cast %48 : vector<1x4x32xf32> to vector<4x32xf32>
    %50 = vector.shape_cast %47 : vector<4x32xf32> to vector<1x4x32xf32>
    tpu.vector_store %arg12[%c3, %c0_32, %c0_33], %50 {strides = array<i32>} : memref<8x4x32xf32, #tpu.memory_space<vmem>>, vector<1x4x32xf32>,
    %51 = vector.extract_strided_slice %13 {offsets = [4, 0, 0], sizes = [1, 4, 32], strides = [1, 1, 1]} : vector<8x4x32xf32> to vector<1x4x32xf32>
    %52 = vector.shape_cast %51 : vector<1x4x32xf32> to vector<4x32xf32>
    %c0_34 = arith.constant 0 : index
    %c0_35 = arith.constant 0 : index
    %53 = vector.load %arg6[%c0_34, %c0_35] : memref<32x32xf32, #tpu.memory_space<vmem>>, vector<32x32xf32>
    %cst_36 = arith.constant dense<0.000000e+00> : vector<4x32xf32>
    %54 = tpu.matmul %47, %53, %cst_36 {dimension_numbers = #tpu.dot_dimension_numbers<[1], [0], [0], [1], [0, 0, 1, 1], [], []>} : vector<4x32xf32>, vector<32x32xf32>, vector<4x32xf32> -> vector<4x32xf32>
    %55 = arith.addf %52, %54 : vector<4x32xf32>
    %56 = math.tanh %55 : vector<4x32xf32>
    %c4 = arith.constant 4 : index
    %c0_37 = arith.constant 0 : index
    %c0_38 = arith.constant 0 : index
    %57 = vector.load %arg12[%c4, %c0_37, %c0_38] : memref<8x4x32xf32, #tpu.memory_space<vmem>>, vector<1x4x32xf32>
    %58 = vector.shape_cast %57 : vector<1x4x32xf32> to vector<4x32xf32>
    %59 = vector.shape_cast %56 : vector<4x32xf32> to vector<1x4x32xf32>
    tpu.vector_store %arg12[%c4, %c0_37, %c0_38], %59 {strides = array<i32>} : memref<8x4x32xf32, #tpu.memory_space<vmem>>, vector<1x4x32xf32>,
    %60 = vector.extract_strided_slice %13 {offsets = [5, 0, 0], sizes = [1, 4, 32], strides = [1, 1, 1]} : vector<8x4x32xf32> to vector<1x4x32xf32>
    %61 = vector.shape_cast %60 : vector<1x4x32xf32> to vector<4x32xf32>
    %c0_39 = arith.constant 0 : index
    %c0_40 = arith.constant 0 : index
    %62 = vector.load %arg6[%c0_39, %c0_40] : memref<32x32xf32, #tpu.memory_space<vmem>>, vector<32x32xf32>
    %cst_41 = arith.constant dense<0.000000e+00> : vector<4x32xf32>
    %63 = tpu.matmul %56, %62, %cst_41 {dimension_numbers = #tpu.dot_dimension_numbers<[1], [0], [0], [1], [0, 0, 1, 1], [], []>} : vector<4x32xf32>, vector<32x32xf32>, vector<4x32xf32> -> vector<4x32xf32>
    %64 = arith.addf %61, %63 : vector<4x32xf32>
    %65 = math.tanh %64 : vector<4x32xf32>
    %c5 = arith.constant 5 : index
    %c0_42 = arith.constant 0 : index
    %c0_43 = arith.constant 0 : index
    %66 = vector.load %arg12[%c5, %c0_42, %c0_43] : memref<8x4x32xf32, #tpu.memory_space<vmem>>, vector<1x4x32xf32>
    %67 = vector.shape_cast %66 : vector<1x4x32xf32> to vector<4x32xf32>
    %68 = vector.shape_cast %65 : vector<4x32xf32> to vector<1x4x32xf32>
    tpu.vector_store %arg12[%c5, %c0_42, %c0_43], %68 {strides = array<i32>} : memref<8x4x32xf32, #tpu.memory_space<vmem>>, vector<1x4x32xf32>,
    %69 = vector.extract_strided_slice %13 {offsets = [6, 0, 0], sizes = [1, 4, 32], strides = [1, 1, 1]} : vector<8x4x32xf32> to vector<1x4x32xf32>
    %70 = vector.shape_cast %69 : vector<1x4x32xf32> to vector<4x32xf32>
    %c0_44 = arith.constant 0 : index
    %c0_45 = arith.constant 0 : index
    %71 = vector.load %arg6[%c0_44, %c0_45] : memref<32x32xf32, #tpu.memory_space<vmem>>, vector<32x32xf32>
    %cst_46 = arith.constant dense<0.000000e+00> : vector<4x32xf32>
    %72 = tpu.matmul %65, %71, %cst_46 {dimension_numbers = #tpu.dot_dimension_numbers<[1], [0], [0], [1], [0, 0, 1, 1], [], []>} : vector<4x32xf32>, vector<32x32xf32>, vector<4x32xf32> -> vector<4x32xf32>
    %73 = arith.addf %70, %72 : vector<4x32xf32>
    %74 = math.tanh %73 : vector<4x32xf32>
    %c6 = arith.constant 6 : index
    %c0_47 = arith.constant 0 : index
    %c0_48 = arith.constant 0 : index
    %75 = vector.load %arg12[%c6, %c0_47, %c0_48] : memref<8x4x32xf32, #tpu.memory_space<vmem>>, vector<1x4x32xf32>
    %76 = vector.shape_cast %75 : vector<1x4x32xf32> to vector<4x32xf32>
    %77 = vector.shape_cast %74 : vector<4x32xf32> to vector<1x4x32xf32>
    tpu.vector_store %arg12[%c6, %c0_47, %c0_48], %77 {strides = array<i32>} : memref<8x4x32xf32, #tpu.memory_space<vmem>>, vector<1x4x32xf32>,
    %78 = vector.extract_strided_slice %13 {offsets = [7, 0, 0], sizes = [1, 4, 32], strides = [1, 1, 1]} : vector<8x4x32xf32> to vector<1x4x32xf32>
    %79 = vector.shape_cast %78 : vector<1x4x32xf32> to vector<4x32xf32>
    %c0_49 = arith.constant 0 : index
    %c0_50 = arith.constant 0 : index
    %80 = vector.load %arg6[%c0_49, %c0_50] : memref<32x32xf32, #tpu.memory_space<vmem>>, vector<32x32xf32>
    %cst_51 = arith.constant dense<0.000000e+00> : vector<4x32xf32>
    %81 = tpu.matmul %74, %80, %cst_51 {dimension_numbers = #tpu.dot_dimension_numbers<[1], [0], [0], [1], [0, 0, 1, 1], [], []>} : vector<4x32xf32>, vector<32x32xf32>, vector<4x32xf32> -> vector<4x32xf32>
    %82 = arith.addf %79, %81 : vector<4x32xf32>
    %83 = math.tanh %82 : vector<4x32xf32>
    %c7 = arith.constant 7 : index
    %c0_52 = arith.constant 0 : index
    %c0_53 = arith.constant 0 : index
    %84 = vector.load %arg12[%c7, %c0_52, %c0_53] : memref<8x4x32xf32, #tpu.memory_space<vmem>>, vector<1x4x32xf32>
    %85 = vector.shape_cast %84 : vector<1x4x32xf32> to vector<4x32xf32>
    %86 = vector.shape_cast %83 : vector<4x32xf32> to vector<1x4x32xf32>
    tpu.vector_store %arg12[%c7, %c0_52, %c0_53], %86 {strides = array<i32>} : memref<8x4x32xf32, #tpu.memory_space<vmem>>, vector<1x4x32xf32>,
    %c0_54 = arith.constant 0 : index
    %c0_55 = arith.constant 0 : index
    %87 = vector.load %arg11[%c0_54, %c0_55] : memref<4x32xf32, #tpu.memory_space<vmem>>, vector<4x32xf32>
    tpu.vector_store %arg11[%c0_54, %c0_55], %83 {strides = array<i32>} : memref<4x32xf32, #tpu.memory_space<vmem>>, vector<4x32xf32>,
    %c0_56 = arith.constant 0 : index
    %c0_57 = arith.constant 0 : index
    %c0_58 = arith.constant 0 : index
    %88 = vector.load %arg12[%c0_56, %c0_57, %c0_58] : memref<8x4x32xf32, #tpu.memory_space<vmem>>, vector<8x4x32xf32>
    %89 = vector.shape_cast %88 : vector<8x4x32xf32> to vector<32x32xf32>
    %c0_59 = arith.constant 0 : index
    %c0_60 = arith.constant 0 : index
    %90 = vector.load %arg8[%c0_59, %c0_60] : memref<32x128xf32, #tpu.memory_space<vmem>>, vector<32x128xf32>
    %cst_61 = arith.constant dense<0.000000e+00> : vector<32x128xf32>
    %91 = tpu.matmul %89, %90, %cst_61 {dimension_numbers = #tpu.dot_dimension_numbers<[1], [0], [0], [1], [0, 0, 1, 1], [], []>} : vector<32x32xf32>, vector<32x128xf32>, vector<32x128xf32> -> vector<32x128xf32>
    %c0_62 = arith.constant 0 : index
    %c0_63 = arith.constant 0 : index
    %92 = vector.load %arg9[%c0_62, %c0_63] : memref<1x128xf32, #tpu.memory_space<vmem>>, vector<1x128xf32>
    %93 = vector.broadcast %92 : vector<1x128xf32> to vector<32x128xf32>
    %94 = arith.addf %91, %93 : vector<32x128xf32>
    %95 = vector.shape_cast %94 : vector<32x128xf32> to vector<8x4x128xf32>
    %c0_64 = arith.constant 0 : index
    %c0_65 = arith.constant 0 : index
    %c0_66 = arith.constant 0 : index
    %96 = vector.load %arg10[%c0_64, %c0_65, %c0_66] : memref<8x4x128xf32, #tpu.memory_space<vmem>>, vector<8x4x128xf32>
    tpu.vector_store %arg10[%c0_64, %c0_65, %c0_66], %95 {strides = array<i32>} : memref<8x4x128xf32, #tpu.memory_space<vmem>>, vector<8x4x128xf32>,
    return
  }
  func.func @transform_0(%arg0: i32) -> (i32, i32, i32) {
    %c0_i32 = arith.constant 0 : i32
    %c0_i32_0 = arith.constant 0 : i32
    %c0_i32_1 = arith.constant 0 : i32
    %c0_i32_2 = arith.constant 0 : i32
    return %c0_i32, %c0_i32_0, %c0_i32_1 : i32, i32, i32
  }
  func.func @transform_1(%arg0: i32) -> (i32, i32) {
    %c0_i32 = arith.constant 0 : i32
    %c0_i32_0 = arith.constant 0 : i32
    %c0_i32_1 = arith.constant 0 : i32
    return %c0_i32, %c0_i32_0 : i32, i32
  }
  func.func @transform_2(%arg0: i32) -> (i32, i32) {
    %c0_i32 = arith.constant 0 : i32
    %c0_i32_0 = arith.constant 0 : i32
    %c0_i32_1 = arith.constant 0 : i32
    return %c0_i32, %c0_i32_0 : i32, i32
  }
  func.func @transform_3(%arg0: i32) -> (i32, i32) {
    %c0_i32 = arith.constant 0 : i32
    %c0_i32_0 = arith.constant 0 : i32
    %c0_i32_1 = arith.constant 0 : i32
    return %c0_i32, %c0_i32_0 : i32, i32
  }
  func.func @transform_4(%arg0: i32) -> (i32, i32) {
    %c0_i32 = arith.constant 0 : i32
    %c0_i32_0 = arith.constant 0 : i32
    %c0_i32_1 = arith.constant 0 : i32
    return %c0_i32, %c0_i32_0 : i32, i32
  }
  func.func @transform_5(%arg0: i32) -> (i32, i32) {
    %c0_i32 = arith.constant 0 : i32
    %c0_i32_0 = arith.constant 0 : i32
    %c0_i32_1 = arith.constant 0 : i32
    return %c0_i32, %c0_i32_0 : i32, i32
  }
  func.func @transform_6(%arg0: i32) -> (i32, i32) {
    %c0_i32 = arith.constant 0 : i32
    %c0_i32_0 = arith.constant 0 : i32
    %c0_i32_1 = arith.constant 0 : i32
    return %c0_i32, %c0_i32_0 : i32, i32
  }
  func.func @transform_7(%arg0: i32) -> (i32, i32) {
    %c0_i32 = arith.constant 0 : i32
    %c0_i32_0 = arith.constant 0 : i32
    %c0_i32_1 = arith.constant 0 : i32
    return %c0_i32, %c0_i32_0 : i32, i32
  }
  func.func @transform_8(%arg0: i32) -> (i32, i32) {
    %c0_i32 = arith.constant 0 : i32
    %c0_i32_0 = arith.constant 0 : i32
    %c0_i32_1 = arith.constant 0 : i32
    return %c0_i32, %c0_i32_0 : i32, i32
  }
  func.func @transform_9(%arg0: i32) -> (i32, i32, i32) {
    %c0_i32 = arith.constant 0 : i32
    %c0_i32_0 = arith.constant 0 : i32
    %c0_i32_1 = arith.constant 0 : i32
    %c0_i32_2 = arith.constant 0 : i32
    return %c0_i32, %c0_i32_0, %c0_i32_1 : i32, i32, i32
  }
  func.func @transform_10(%arg0: i32) -> (i32, i32) {
    %c0_i32 = arith.constant 0 : i32
    %c0_i32_0 = arith.constant 0 : i32
    %c0_i32_1 = arith.constant 0 : i32
    return %c0_i32, %c0_i32_0 : i32, i32
  }
}

</mosaic_0001>

<bundles_post_ra>
// kernel: tpu_custom_call.1
= control target key start
LH: loop header
LB: loop body
LE: loop exit
PB: predicated region body
PF: predicated region fallthrough
CT: control target
= control target key end

     0   :  { %16 = vsyncpa [#allocation4], 0  ;;  %s1952_s0 = inlined_call_operand.hbm [shape: f32[8,4,32], index: 0, kind: input, shape index: {}]   ;;  %s1953_s1 = inlined_call_operand.hbm [shape: f32[4,32], index: 1, kind: input, shape index: {}]   ;;  %s1954_s2 = inlined_call_operand.vmem [shape: f32[4,32], index: 2, kind: input, shape index: {}]   ;;  %s1955_s3 = inlined_call_operand.hbm [shape: f32[32,32], index: 3, kind: input, shape index: {}]   ;;  %s1956_s4 = inlined_call_operand.hbm [shape: f32[32,32], index: 4, kind: input, shape index: {}]   ;;  %s1957_s5 = inlined_call_operand.hbm [shape: f32[32,32], index: 5, kind: input, shape index: {}]   ;;  %s1958_s6 = inlined_call_operand.vmem [shape: f32[1,32], index: 6, kind: input, shape index: {}]   ;;  %s1959_s7 = inlined_call_operand.hbm [shape: f32[32,128], index: 7, kind: input, shape index: {}]   ;;  %s1960_s8 = inlined_call_operand.vmem [shape: f32[1,128], index: 8, kind: input, shape index: {}]   ;;  %s1961_s9 = inlined_call_operand.hbm [shape: f32[8,4,128], index: 9, kind: output, shape index: {0}]   ;;  %s1962_s10 = inlined_call_operand.hbm [shape: f32[4,32], index: 10, kind: output, shape index: {1}]  }
   0x1   :  { %17 = vsyncpa [#allocation7], 0 }
   0x2   :  { %18 = vsyncpa [#allocation10], 0 }
   0x3   :  { %19 = vsyncpa [#allocation13], 0 }
   0x4   :  { %20 = vsyncpa [#allocation5], 0 }
   0x5   :  { %21 = vsyncpa [#allocation16], 0  ;;  %s1671_s13 = smov [#allocation6]   ;;  %s1483_s17 = scalar_lea.hbm %s1953_s1, 64 }
   0x6   :  { %s40_s14 = sshll.u32 %s1671_s13, 4  ;;  %p1484_p0 = scmp.ne.s32.totalorder %s1953_s1, %s1483_s17  ;;  %s41_s14 = int_to_ptr.vmem [resolvable:$true] %s40_s14 }
   0x7   :  { %p1487_p1 = scmp.lt.u32.totalorder %s1483_s17, %s1953_s1 }
   0x9   :  { %p1489_p2 = pnand %p1487_p1, %p1484_p0 }
   0xb   :  { %1492 = shalt.err (!%p1489_p2)
}
   0xc   :  { %s1493_s22 = scalar_lea.vmem %s41_s14, 64  ;;  %p1498_p4 = scmp.lt.s32.totalorder %s41_s14, %s41_s14 }
   0xd   :  { %p1494_p3 = scmp.ne.s32.totalorder %s41_s14, %s1493_s22  ;;  %p1499_p5 = scmp.lt.s32.totalorder %s1493_s22, %s1493_s22 }
   0xf   :  { %p1500_p6 = por %p1499_p5, %p1498_p4 }
  0x11   :  { %p1501_p7 = pnand %p1500_p6, %p1494_p3 }
  0x13   :  { %1504 = shalt.err (!%p1501_p7)
}
  0x14   :  { %43 = dma.hbm_to_vmem [thread:$0]  %s1953_s1, 64, %s41_s14, [#allocation7]  }
  0x15   :  { %s1672_s25 = smov [#allocation9]   ;;  %s1673_s27 = smov [#allocation3]  }
  0x16   :  { %s63_s26 = sshll.u32 %s1672_s25, 4  ;;  %s27_s28 = sshll.u32 %s1673_s27, 4  ;;  %s64_s26 = int_to_ptr.vmem [resolvable:$true] %s63_s26  ;;  %s28_s28 = int_to_ptr.vmem [resolvable:$true] %s27_s28 }
  0x17   :  { %s1505_s11 = scalar_lea.hbm %s1956_s4, 512 }
  0x18   :  { %p1506_p8 = scmp.ne.s32.totalorder %s1956_s4, %s1505_s11  ;;  %p1509_p9 = scmp.lt.u32.totalorder %s1505_s11, %s1956_s4 }
  0x1a   :  { %p1511_p10 = pnand %p1509_p9, %p1506_p8 }
  0x1c   :  { %1514 = shalt.err (!%p1511_p10)
}
  0x1d   :  { %s1515_s1 = scalar_lea.vmem %s64_s26, 512  ;;  %p1520_p12 = scmp.lt.s32.totalorder %s64_s26, %s64_s26 }
  0x1e   :  { %p1516_p11 = scmp.ne.s32.totalorder %s64_s26, %s1515_s1  ;;  %p1521_p13 = scmp.lt.s32.totalorder %s1515_s1, %s1515_s1 }
  0x20   :  { %p1522_p0 = por %p1521_p13, %p1520_p12 }
  0x22   :  { %p1523_p1 = pnand %p1522_p0, %p1516_p11 }
  0x24   :  { %1526 = shalt.err (!%p1523_p1)
}
  0x25   :  { %s1674_s14 = smov 128   ;;  %s1675_s17 = smov 8  }
  0x26   :  { %69 = dma.hbm_to_vmem [thread:$0]  %s1956_s4, 512, %s64_s26, [#allocation10], %s1674_s14, %s1674_s14, %s1675_s17  }
  0x27   :  { %s1527_s22 = scalar_lea.hbm %s1952_s0, 512 }
  0x28   :  { %p1528_p2 = scmp.ne.s32.totalorder %s1952_s0, %s1527_s22  ;;  %p1531_p3 = scmp.lt.u32.totalorder %s1527_s22, %s1952_s0 }
  0x2a   :  { %p1533_p4 = pnand %p1531_p3, %p1528_p2 }
  0x2c   :  { %1536 = shalt.err (!%p1533_p4)
}
  0x2d   :  { %s1537_s29 = scalar_lea.vmem %s28_s28, 512  ;;  %p1542_p6 = scmp.lt.s32.totalorder %s28_s28, %s28_s28 }
  0x2e   :  { %p1538_p5 = scmp.ne.s32.totalorder %s28_s28, %s1537_s29  ;;  %p1543_p7 = scmp.lt.s32.totalorder %s1537_s29, %s1537_s29 }
  0x30   :  { %p1544_p8 = por %p1543_p7, %p1542_p6 }
  0x32   :  { %p1545_p9 = pnand %p1544_p8, %p1538_p5 }
  0x34   :  { %1548 = shalt.err (!%p1545_p9)
}
  0x35   :  { %s1676_s4 = smov 64   ;;  %s1677_s26 = smov 4  }
  0x36   :  { %33 = dma.hbm_to_vmem [thread:$0]  %s1952_s0, 512, %s28_s28, [#allocation4], %s1676_s4, %s1676_s4, %s1677_s26  }
  0x37   :  { %s1678_s12 = smov [#allocation8]   ;;  %s1679_s15 = smov [#allocation11]  }
  0x38   :  { %s51_s13 = sshll.u32 %s1678_s12, 4  ;;  %s75_s16 = sshll.u32 %s1679_s15, 4  ;;  %s52_s13 = int_to_ptr.vmem [resolvable:$true] %s51_s13  ;;  %s76_s16 = int_to_ptr.vmem [resolvable:$true] %s75_s16 }
  0x39   :  { %s1549_s19 = scalar_lea.hbm %s1955_s3, 512 }
  0x3a   :  { %p1550_p10 = scmp.ne.s32.totalorder %s1955_s3, %s1549_s19  ;;  %p1553_p11 = scmp.lt.u32.totalorder %s1549_s19, %s1955_s3 }
  0x3c   :  { %p1555_p12 = pnand %p1553_p11, %p1550_p10 }
  0x3e   :  { %1558 = shalt.err (!%p1555_p12)
}
  0x3f   :  { %s1559_s0 = scalar_lea.vmem %s52_s13, 512  ;;  %p1564_p0 = scmp.lt.s32.totalorder %s52_s13, %s52_s13 }
  0x40   :  { %p1560_p13 = scmp.ne.s32.totalorder %s52_s13, %s1559_s0  ;;  %p1565_p1 = scmp.lt.s32.totalorder %s1559_s0, %s1559_s0 }
  0x42   :  { %p1566_p2 = por %p1565_p1, %p1564_p0 }
  0x44   :  { %p1567_p3 = pnand %p1566_p2, %p1560_p13 }
  0x46   :  { %1570 = shalt.err (!%p1567_p3)
}
  0x47   :  { %57 = dma.hbm_to_vmem [thread:$0]  %s1955_s3, 512, %s52_s13, [#allocation7], %s1674_s14, %s1674_s14, %s1675_s17  }
  0x48   :  { %s1571_s29 = scalar_lea.hbm %s1957_s5, 512 }
  0x49   :  { %p1572_p4 = scmp.ne.s32.totalorder %s1957_s5, %s1571_s29  ;;  %p1575_p5 = scmp.lt.u32.totalorder %s1571_s29, %s1957_s5 }
  0x4b   :  { %p1577_p6 = pnand %p1575_p5, %p1572_p4 }
  0x4d   :  { %1580 = shalt.err (!%p1577_p6)
}
  0x4e   :  { %s1581_s1 = scalar_lea.vmem %s76_s16, 512  ;;  %p1586_p8 = scmp.lt.s32.totalorder %s76_s16, %s76_s16 }
  0x4f   :  { %p1582_p7 = scmp.ne.s32.totalorder %s76_s16, %s1581_s1  ;;  %p1587_p9 = scmp.lt.s32.totalorder %s1581_s1, %s1581_s1 }
  0x51   :  { %p1588_p10 = por %p1587_p9, %p1586_p8 }
  0x53   :  { %p1589_p11 = pnand %p1588_p10, %p1582_p7 }
  0x55   :  { %1592 = shalt.err (!%p1589_p11)
}
  0x56   :  { %81 = dma.hbm_to_vmem [thread:$0]  %s1957_s5, 512, %s76_s16, [#allocation10], %s1674_s14, %s1674_s14, %s1675_s17  }
  0x57   :  { %s1680_s18 = smov [#allocation12]   ;;  %s1593_s22 = scalar_lea.hbm %s1959_s7, 512 }
  0x58   :  { %s89_s19 = sshll.u32 %s1680_s18, 4  ;;  %p1594_p12 = scmp.ne.s32.totalorder %s1959_s7, %s1593_s22  ;;  %s90_s19 = int_to_ptr.vmem [resolvable:$true] %s89_s19 }
  0x59   :  { %p1597_p13 = scmp.lt.u32.totalorder %s1593_s22, %s1959_s7 }
  0x5b   :  { %p1599_p0 = pnand %p1597_p13, %p1594_p12 }
  0x5d   :  { %1602 = shalt.err (!%p1599_p0)
}
  0x5e   :  { %s1603_s25 = scalar_lea.vmem %s90_s19, 512  ;;  %p1608_p2 = scmp.lt.s32.totalorder %s90_s19, %s90_s19 }
  0x5f   :  { %p1604_p1 = scmp.ne.s32.totalorder %s90_s19, %s1603_s25  ;;  %p1609_p3 = scmp.lt.s32.totalorder %s1603_s25, %s1603_s25 }
  0x61   :  { %p1610_p4 = por %p1609_p3, %p1608_p2 }
  0x63   :  { %p1611_p5 = pnand %p1610_p4, %p1604_p1 }
  0x65   :  { %1614 = shalt.err (!%p1611_p5)
}
  0x66   :  { %95 = dma.hbm_to_vmem [thread:$0]  %s1959_s7, 512, %s90_s19, [#allocation13], %s1674_s14, %s1674_s14, %s1675_s17  }
  0x67   :  { %1659 = dma.done.wait [#allocation4], 512  }
  0x68   :  { %1660 = vsyncadd [#allocation4], 4294966784 }
  0x69   :  { %1661 = dma.done.wait [#allocation7], 576  }
  0x6a   :  { %1662 = vsyncadd [#allocation7], 4294966720 }
  0x6b   :  { %1663 = dma.done.wait [#allocation10], 1024  }
  0x6c   :  { %1664 = vsyncadd [#allocation10], 4294966272 }
  0x6d   :  { %1665 = dma.done.wait [#allocation13], 512  }
  0x6e   :  { %1666 = vsyncadd [#allocation13], 4294966784  ;;  %v1681_v0 = vmov 0.0|0.0   ;;  %vm1682_vm0 = vmmov 0   ;;  %v1683_v1 = vmov 0.0   ;;  %v117_v2 = vld [vmem:[#allocation9] sm:$0xff] }
  0x6f   :  { %1374 = vmatprep.subr.bf16.mxu1 %v1681_v0  ;;  %1255 = vmatprep.mubr.msk.f32.mxu1 %vm1682_vm0, %v1683_v1  ;;  %v118_v3 = vld [vmem:[#allocation9 + $0x8] sm:$0xff]  ;;  %v119_v4 = vld [vmem:[#allocation9 + $0x10] sm:$0xff]  ;;  %v120_v6 = vld [vmem:[#allocation9 + $0x18] sm:$0xff]  ;;  %vm128_vm1 = vcmask 261120   ;;  %vm419_vm2 = vcmask 257024  }
  0x70   :  { %1388 = vmatprep.subr.bf16.mxu0 %v1681_v0  ;;  %1280 = vmatprep.mubr.msk.f32.mxu0 %vm1682_vm0, %v1683_v1  ;;  %v1375_v5 = vpack.c.bf16 %v118_v3, %v117_v2  ;;  %v210_v7 = vld [vmem:[#allocation8] sm:$0xff]  ;;  %v211_v8 = vld [vmem:[#allocation8 + $0x8] sm:$0xff]  ;;  %v1378_v11 = vpack.c.bf16 %v120_v6, %v119_v4  ;;  %v212_v13 = vld [vmem:[#allocation8 + $0x10] sm:$0xff] }
  0x71   :  { %v340_v9 = vld [vmem:[#allocation11] sm:$0xff]  ;;  %v341_v10 = vld [vmem:[#allocation11 + $0x8] sm:$0xff]  ;;  %v1380_v14 = vpack.c.bf16 %v211_v8, %v210_v7  ;;  %v213_v15 = vld [vmem:[#allocation8 + $0x18] sm:$0xff] }
  0x72   :  { %1376 = vmatpush3.bf16.msra.mxu1 %v1375_v5  ;;  %v1834_v12 = vpack.c.bf16 %v341_v10, %v340_v9  ;;  %v342_v16 = vld [vmem:[#allocation11 + $0x10] sm:$0xff]  ;;  %v343_v17 = vld [vmem:[#allocation11 + $0x18] sm:$0xff]  ;;  %v1384_v21 = vpack.c.bf16 %v213_v15, %v212_v13  ;;  %v1460_v23 = vld [vmem:[#allocation3 + $0x8] sm:$0xff]  }
  0x73   :  { %1377 = vmatprep.subr.bf16.mxu1 %v1681_v0  ;;  %v116_v18 = vld [vmem:[#allocation6] sm:$0xf]  ;;  %v1839_v19 = vpack.c.bf16 %v343_v17, %v342_v16  ;;  %v1461_v24 = vld [vmem:[#allocation3 + $0x10] sm:$0xff]   ;;  %v1462_v25 = vld [vmem:[#allocation3 + $0x18] sm:$0xff]  }
  0x74   :  { %1390 = vmatpush3.bf16.msra.mxu0 %v1834_v12  ;;  %v1459_v20 = vld [vmem:[#allocation3] sm:$0xff]   ;;  %v998_v5 = vld [vmem:[#allocation12 + $0x8] sm:$0xff]  ;;  %v999_v10 = vld [vmem:[#allocation12 + $0x10] sm:$0xff] }
  0x75   :  { %1391 = vmatprep.subr.bf16.mxu0 %v1681_v0  ;;  %v339_v22 = vld [vmem:[%s1954_s2] sm:$0xf]  ;;  %v997_v4 = vld [vmem:[#allocation12] sm:$0xff] }
  0x76   :  { %1379 = vmatpush3.bf16.msra.mxu1 %v1378_v11  ;;  %v1167_v30 = vld [vmem:[%s1958_s6] ss:$0 sm:$0xff]  ;;  %v1436_v6 = vpack.c.bf16 %v998_v5, %v997_v4 }
  0x77   :  { %1381 = vmatprep.subr.bf16.mxu1 %v1380_v14  ;;  %v1000_v11 = vld [vmem:[#allocation12 + $0x18] sm:$0xff] }
  0x78   :  { %1393 = vmatpush3.bf16.msra.mxu0 %v1839_v19  ;;  %v1440_v13 = vpack.c.bf16 %v1000_v11, %v999_v10 }
  0x79   :  { %1256 = vmatmul.mubr.msk.f32.vlgmr.msra.gmra.mrb[0].mxu1 %vm128_vm1, %v116_v18  ;;  %1400 = vmatprep.subr.bf16.mxu0 %v1681_v0  ;;  %v1181_v18 = vld [vmem:[%s1960_s8] ss:$0 sm:$0xff]  ;;  %s1684_s8 = smov [#allocation15]  }
  0x7a   :  { %1383 = vmatpush3.bf16.msra.mxu1 %v1380_v14  ;;  %1266 = vmatprep.mubr.msk.f32.mxu1 %vm128_vm1, %v1459_v20  ;;  %s1151_s29 = sshll.u32 %s1684_s8, 4  ;;  %s1152_s29 = int_to_ptr.vmem [resolvable:$true] %s1151_s29 }
  0x7b   :  { %1385 = vmatprep.subr.bf16.mxu1 %v1384_v21  ;;  %1281 = vmatmul.mubr.msk.f32.vlgmr.msra.gmra.mrb[0].mxu0 %vm128_vm1, %v339_v22  ;;  %s1615_s30 = scalar_lea.vmem %s1152_s29, 64  ;;  %p1620_p7 = scmp.lt.s32.totalorder %s1152_s29, %s1152_s29 }
  0x7c   :  { %1402 = vmatpush3.bf16.msra.mxu0 %v1834_v12  ;;  %1302 = vmatprep.mubr.msk.f32.mxu0 %vm1682_vm0, %v1683_v1  ;;  %p1616_p6 = scmp.ne.s32.totalorder %s1152_s29, %s1615_s30  ;;  %p1621_p8 = scmp.lt.s32.totalorder %s1615_s30, %s1615_s30 }
  0x7d   :  { %1403 = vmatprep.subr.bf16.mxu0 %v1681_v0 }
  0x7e   :  { %1387 = vmatpush3.bf16.msra.mxu1 %v1384_v21  ;;  %p1622_p9 = por %p1621_p8, %p1620_p7 }
  0x7f   :  { %1394 = vmatprep.subr.bf16.mxu1 %v1681_v0 }
  0x80   :  { %1405 = vmatpush3.bf16.msra.mxu0 %v1839_v19  ;;  %p1623_p10 = pnand %p1622_p9, %p1616_p6 }
  0x81   :  { %1267 = vmatmul.mubr.msk.f32.vlgmr.msra.gmra.mrb[2].mxu1 %vm128_vm1, %v1460_v23  ;;  %1412 = vmatprep.subr.bf16.mxu0 %v1681_v0 }
  0x82   :  { %1269 = vmatprep.mubr.msk.f32.mxu1 %vm128_vm1, %v1461_v24  ;;  %1396 = vmatpush3.bf16.msra.mxu1 %v1834_v12 }
  0x83   :  { %1397 = vmatprep.subr.bf16.mxu1 %v1681_v0 }
  0x85   :  { %1270 = vmatmul.mubr.msk.f32.gmra.mrb[4].mxu1 %vm128_vm1, %v1462_v25 }
  0x86   :  { %1399 = vmatpush3.bf16.msra.mxu1 %v1839_v19  ;;  %1291 = vmatprep.mubr.msk.f32.mxu1 %vm1682_vm0, %v1683_v1 }
  0x87   :  { %1406 = vmatprep.subr.bf16.mxu1 %v1681_v0 }
 0x14c   :  { %v198_v26 = vpop.f32.mrb[0].mxu1 }
 0x14d   :  { %v1257_v27 = vpop.f32.mrb[1].mxu1  ;;  %v199_v31 = vadd.f32 %v1167_v30, %v198_v26 }
 0x14e   :  { %v413_v28 = vpop.f32.mrb[0].mxu0 }
 0x14f   :  { %v1282_v29 = vpop.f32.mrb[1].mxu0 }
 0x154   :  { %v1268_v32 = vpop.f32.mrb[2].mxu1 }
 0x155   :  { %v324_v33 = vcombine.high %v1268_v32, %v1268_v32  ;;  %v333_v34 = vadd.f32 %v1268_v32, %v199_v31  ;;  %v300_v35 = vpop.f32.mrb[3].mxu1 }
 0x156   :  { %v323_v36 = vcombine.high %v300_v35, %v300_v35  ;;  %v331_v37 = vadd.f32 %v300_v35, %v199_v31 }
 0x157   :  { %v334_v38 = vadd.f32 %v324_v33, %v199_v31 }
 0x158   :  { %v417_v39 = vadd.f32 %v413_v28, %v331_v37  ;;  %v1271_v40 = vpop.f32.mrb[4].mxu1  ;;  %v332_v41 = vadd.f32 %v323_v36, %v199_v31 }
 0x159   :  { %v326_v42 = vcombine.high %v1271_v40, %v1271_v40  ;;  %v1868_v43 = vadd.f32 %v1271_v40, %v199_v31  ;;  %v310_v44 = vpop.f32.mrb[5].mxu1 }
 0x15a   :  { %1467 = vtanh.f32 %v417_v39  ;;  %v325_v45 = vcombine.high %v310_v44, %v310_v44  ;;  %v335_v46 = vadd.f32 %v310_v44, %v199_v31 }
 0x15b   :  { %v1870_v47 = vadd.f32 %v326_v42, %v199_v31 }
 0x15c   :  { %v336_v48 = vadd.f32 %v325_v45, %v199_v31 }
 0x164   :  { %v1468_v49 = vpop.eup %1467 }
 0x165   :  { %420 = vst.msk [vmem:[#allocation2] sm:$0xf] %vm419_vm2, %v1468_v49  ;;  %1292 = vmatmul.mubr.msk.f32.vlgmr.msra.gmra.mrb[6].mxu1 %vm128_vm1, %v1468_v49 }
 0x166   :  { %1408 = vmatpush3.bf16.msra.mxu1 %v1834_v12  ;;  %1313 = vmatprep.mubr.msk.f32.mxu1 %vm1682_vm0, %v1683_v1 }
 0x167   :  { %1409 = vmatprep.subr.bf16.mxu1 %v1681_v0 }
 0x16a   :  { %1411 = vmatpush3.bf16.msra.mxu1 %v1839_v19 }
 0x16b   :  { %1418 = vmatprep.subr.bf16.mxu1 %v1681_v0 }
 0x238   :  { %v494_v50 = vpop.f32.mrb[6].mxu1 }
 0x239   :  { %v498_v51 = vadd.f32 %v494_v50, %v332_v41  ;;  %v1293_v52 = vpop.f32.mrb[7].mxu1 }
 0x23b   :  { %1469 = vtanh.f32 %v498_v51 }
 0x245   :  { %v1470_v53 = vpop.eup %1469 }
 0x246   :  { %501 = vst.msk [vmem:[#allocation2 + $0x4] sm:$0xf] %vm419_vm2, %v1470_v53  ;;  %1303 = vmatmul.mubr.msk.f32.vlgmr.msra.gmra.mrb[2].mxu0 %vm128_vm1, %v1470_v53 }
 0x247   :  { %1414 = vmatpush3.bf16.msra.mxu0 %v1834_v12  ;;  %1324 = vmatprep.mubr.msk.f32.mxu0 %vm1682_vm0, %v1683_v1 }
 0x248   :  { %1415 = vmatprep.subr.bf16.mxu0 %v1681_v0 }
 0x24b   :  { %1417 = vmatpush3.bf16.msra.mxu0 %v1839_v19 }
 0x24c   :  { %1424 = vmatprep.subr.bf16.mxu0 %v1681_v0 }
 0x319   :  { %v575_v54 = vpop.f32.mrb[2].mxu0 }
 0x31a   :  { %v579_v55 = vadd.f32 %v575_v54, %v333_v34  ;;  %v1304_v56 = vpop.f32.mrb[3].mxu0 }
 0x31c   :  { %1471 = vtanh.f32 %v579_v55 }
 0x326   :  { %v1472_v57 = vpop.eup %1471 }
 0x327   :  { %582 = vst.msk [vmem:[#allocation2 + $0x8] sm:$0xf] %vm419_vm2, %v1472_v57  ;;  %1314 = vmatmul.mubr.msk.f32.vlgmr.msra.gmra.mrb[8].mxu1 %vm128_vm1, %v1472_v57 }
 0x328   :  { %1420 = vmatpush3.bf16.msra.mxu1 %v1834_v12  ;;  %1335 = vmatprep.mubr.msk.f32.mxu1 %vm1682_vm0, %v1683_v1 }
 0x329   :  { %1421 = vmatprep.subr.bf16.mxu1 %v1681_v0 }
 0x32c   :  { %1423 = vmatpush3.bf16.msra.mxu1 %v1839_v19 }
 0x32d   :  { %1430 = vmatprep.subr.bf16.mxu1 %v1681_v0 }
 0x3fa   :  { %v656_v58 = vpop.f32.mrb[8].mxu1 }
 0x3fb   :  { %v660_v59 = vadd.f32 %v656_v58, %v334_v38  ;;  %v1315_v60 = vpop.f32.mrb[9].mxu1 }
 0x3fd   :  { %1473 = vtanh.f32 %v660_v59 }
 0x407   :  { %v1474_v61 = vpop.eup %1473 }
 0x408   :  { %663 = vst.msk [vmem:[#allocation2 + $0xc] sm:$0xf] %vm419_vm2, %v1474_v61  ;;  %1325 = vmatmul.mubr.msk.f32.vlgmr.msra.gmra.mrb[4].mxu0 %vm128_vm1, %v1474_v61 }
 0x409   :  { %1426 = vmatpush3.bf16.msra.mxu0 %v1834_v12  ;;  %1346 = vmatprep.mubr.msk.f32.mxu0 %vm1682_vm0, %v1683_v1 }
 0x40a   :  { %1427 = vmatprep.subr.bf16.mxu0 %v1681_v0 }
 0x40d   :  { %1429 = vmatpush3.bf16.msra.mxu0 %v1839_v19 }
 0x40e   :  { %1437 = vmatprep.subr.bf16.mxu0 %v1436_v6 }
 0x4db   :  { %v737_v62 = vpop.f32.mrb[4].mxu0 }
 0x4dc   :  { %v741_v63 = vadd.f32 %v737_v62, %v335_v46  ;;  %v1326_v2 = vpop.f32.mrb[5].mxu0 }
 0x4de   :  { %1475 = vtanh.f32 %v741_v63 }
 0x4e8   :  { %v1476_v3 = vpop.eup %1475 }
 0x4e9   :  { %744 = vst.msk [vmem:[#allocation2 + $0x10] sm:$0xf] %vm419_vm2, %v1476_v3  ;;  %1336 = vmatmul.mubr.msk.f32.vlgmr.msra.gmra.mrb[10].mxu1 %vm128_vm1, %v1476_v3 }
 0x4ea   :  { %1432 = vmatpush3.bf16.msra.mxu1 %v1834_v12  ;;  %1357 = vmatprep.mubr.msk.f32.mxu1 %vm1682_vm0, %v1683_v1  ;;  %v1463_v12 = vld [vmem:[#allocation2] sm:$0xff]  }
 0x4eb   :  { %1433 = vmatprep.subr.bf16.mxu1 %v1681_v0  ;;  %v1464_v0 = vld [vmem:[#allocation2 + $0x8] sm:$0xff]  }
 0x4ee   :  { %1435 = vmatpush3.bf16.msra.mxu1 %v1839_v19 }
 0x5bc   :  { %v818_v7 = vpop.f32.mrb[10].mxu1 }
 0x5bd   :  { %v822_v8 = vadd.f32 %v818_v7, %v336_v48  ;;  %v1337_v9 = vpop.f32.mrb[11].mxu1 }
 0x5bf   :  { %1477 = vtanh.f32 %v822_v8 }
 0x5c9   :  { %v1478_v14 = vpop.eup %1477 }
 0x5ca   :  { %825 = vst.msk [vmem:[#allocation2 + $0x14] sm:$0xf] %vm419_vm2, %v1478_v14  ;;  %1347 = vmatmul.mubr.msk.f32.vlgmr.msra.gmra.mrb[6].mxu0 %vm128_vm1, %v1478_v14 }
 0x5cb   :  { %1439 = vmatpush3.bf16.msra.mxu0 %v1436_v6  ;;  %1368 = vmatprep.mubr.msk.f32.mxu0 %vm128_vm1, %v1463_v12 }
 0x5cc   :  { %1441 = vmatprep.subr.bf16.mxu0 %v1440_v13 }
 0x5cf   :  { %1443 = vmatpush3.bf16.msra.mxu0 %v1440_v13 }
 0x5d1   :  { %v1465_v1 = vld [vmem:[#allocation2 + $0x10] sm:$0xff]  }
 0x5d2   :  { %1369 = vmatmul.mubr.msk.f32.vlgmr.msra.gmra.mrb[8].mxu0 %vm128_vm1, %v1464_v0 }
 0x5d3   :  { %1371 = vmatprep.mubr.msk.f32.mxu0 %vm128_vm1, %v1465_v1 }
 0x69d   :  { %v899_v15 = vpop.f32.mrb[6].mxu0 }
 0x69e   :  { %v903_v16 = vadd.f32 %v899_v15, %v1868_v43  ;;  %v1348_v17 = vpop.f32.mrb[7].mxu0 }
 0x6a0   :  { %1479 = vtanh.f32 %v903_v16 }
 0x6a5   :  { %v1370_v19 = vpop.f32.mrb[8].mxu0 }
 0x6a6   :  { %v1100_v20 = vadd.f32 %v1370_v19, %v1181_v18  ;;  %v1094_v21 = vpop.f32.mrb[9].mxu0 }
 0x6a7   :  { %v1095_v22 = vadd.f32 %v1181_v18, %v1094_v21 }
 0x6a8   :  { %v1118_v23 = vcombine.high %v1100_v20, %v1100_v20  ;;  %1127 = vst [vmem:[#allocation14 + $0x8] sm:$0xf] %v1100_v20 }
 0x6a9   :  { %v1117_v24 = vcombine.high %v1095_v22, %v1095_v22  ;;  %1125 = vst [vmem:[#allocation14] sm:$0xf] %v1095_v22 }
 0x6aa   :  { %v1480_v25 = vpop.eup %1479  ;;  %1128 = vst [vmem:[#allocation14 + $0xc] sm:$0xf] %v1118_v23 }
 0x6ab   :  { %906 = vst.msk [vmem:[#allocation2 + $0x18] sm:$0xf] %vm419_vm2, %v1480_v25  ;;  %1126 = vst [vmem:[#allocation14 + $0x4] sm:$0xf] %v1117_v24  ;;  %1358 = vmatmul.mubr.msk.f32.vlgmr.msra.gmra.mrb[12].mxu1 %vm128_vm1, %v1480_v25 }
 0x77e   :  { %v980_v26 = vpop.f32.mrb[12].mxu1 }
 0x77f   :  { %v984_v27 = vadd.f32 %v980_v26, %v1870_v47  ;;  %v1359_v28 = vpop.f32.mrb[13].mxu1 }
 0x781   :  { %1481 = vtanh.f32 %v984_v27 }
 0x78b   :  { %v1482_v29 = vpop.eup %1481 }
 0x78c   :  { %987 = vst.msk [vmem:[#allocation2 + $0x1c] sm:$0xf] %vm419_vm2, %v1482_v29  ;;  %988 = vst.msk [vmem:[#allocation15] sm:$0xf] %vm419_vm2, %v1482_v29 }
 0x793   :  { %v1466_v30 = vld [vmem:[#allocation2 + $0x18] sm:$0xff]  }
 0x794   :  { %1372 = vmatmul.mubr.msk.f32.gmra.mrb[10].mxu0 %vm128_vm1, %v1466_v30 }
 0x795   :  { %1626 = shalt.err (!%p1623_p10)
}
 0x796   :  { %s1627_s15 = scalar_lea.hbm %s1962_s10, 64 }
 0x797   :  { %p1628_p11 = scmp.ne.s32.totalorder %s1962_s10, %s1627_s15  ;;  %p1631_p12 = scmp.lt.u32.totalorder %s1627_s15, %s1962_s10 }
 0x799   :  { %p1633_p13 = pnand %p1631_p12, %p1628_p11 }
 0x79b   :  { %1636 = shalt.err (!%p1633_p13)
}
 0x79c   :  { %1154 = dma.vmem_to_hbm [thread:$0]  %s1152_s29, 64, %s1962_s10, [#allocation16]  }
 0x79d   :  { %s1685_s21 = smov [#allocation14]  }
 0x79e   :  { %s1138_s22 = sshll.u32 %s1685_s21, 4  ;;  %s1139_s22 = int_to_ptr.vmem [resolvable:$true] %s1138_s22 }
 0x79f   :  { %s1637_s23 = scalar_lea.vmem %s1139_s22, 512  ;;  %p1642_p1 = scmp.lt.s32.totalorder %s1139_s22, %s1139_s22 }
 0x7a0   :  { %p1638_p0 = scmp.ne.s32.totalorder %s1139_s22, %s1637_s23  ;;  %p1643_p2 = scmp.lt.s32.totalorder %s1637_s23, %s1637_s23 }
 0x7a2   :  { %p1644_p3 = por %p1643_p2, %p1642_p1 }
 0x7a4   :  { %p1645_p4 = pnand %p1644_p3, %p1638_p0 }
 0x867   :  { %v1373_v31 = vpop.f32.mrb[10].mxu0 }
 0x868   :  { %v1110_v32 = vadd.f32 %v1373_v31, %v1181_v18  ;;  %v1104_v33 = vpop.f32.mrb[11].mxu0 }
 0x869   :  { %v1105_v34 = vadd.f32 %v1181_v18, %v1104_v33 }
 0x86a   :  { %v1120_v35 = vcombine.high %v1110_v32, %v1110_v32  ;;  %1131 = vst [vmem:[#allocation14 + $0x18] sm:$0xf] %v1110_v32 }
 0x86b   :  { %v1119_v36 = vcombine.high %v1105_v34, %v1105_v34  ;;  %1129 = vst [vmem:[#allocation14 + $0x10] sm:$0xf] %v1105_v34 }
 0x86c   :  { %1132 = vst [vmem:[#allocation14 + $0x1c] sm:$0xf] %v1120_v35 }
 0x86d   :  { %1130 = vst [vmem:[#allocation14 + $0x14] sm:$0xf] %v1119_v36 }
 0x86e   :  { %1648 = shalt.err (!%p1645_p4)
}
 0x86f   :  { %s1649_s28 = scalar_lea.hbm %s1961_s9, 512 }
 0x870   :  { %p1650_p5 = scmp.ne.s32.totalorder %s1961_s9, %s1649_s28  ;;  %p1653_p6 = scmp.lt.u32.totalorder %s1649_s28, %s1961_s9 }
 0x872   :  { %p1655_p7 = pnand %p1653_p6, %p1650_p5 }
 0x874   :  { %1658 = shalt.err (!%p1655_p7)
}
 0x875   :  { %1144 = dma.vmem_to_hbm [thread:$0]  %s1139_s22, 512, %s1961_s9, [#allocation5], %s1676_s4, %s1676_s4, %s1677_s26  }
 0x876   :  { %1667 = dma.done.wait [#allocation5], 512  }
 0x877   :  { %1668 = vsyncadd [#allocation5], 4294966784 }
 0x878   :  { %1669 = dma.done.wait [#allocation16], 64  }
 0x879   :  { %1670 = vsyncadd [#allocation16], 4294967232 }
 0x87a   :  { %1161 = vsyncpa [#allocation4], 1 }
 0x87b   :  { %1162 = vsyncpa [#allocation7], 1 }
 0x87c   :  { %1163 = vsyncpa [#allocation10], 1 }
 0x87d   :  { %1164 = vsyncpa [#allocation13], 1 }
 0x87e   :  { %1165 = vsyncpa [#allocation5], 1 }
 0x87f   :  { %1166 = vsyncpa [#allocation16], 1 }

</bundles_post_ra>
